<compile_context>
chip_gen: v7x
topology: tpu7x:2x2x1
jax: 0.10.0
libtpu: 0.0.40
codegen_flags: <defaults>
</compile_context>

<pallas_src>
import functools

import jax
import jax.numpy as jnp
from jax.experimental import pallas as pl
from jax.experimental.pallas import tpu as pltpu

_EPS = 1e-5
_VMEM_LIMIT = 32 * 1024 * 1024  # safe on v5e/v6e/v7x


# ----------------------------- kernels --------------------------------------


def _stats_kernel(x_ref, sum_ref, sq_ref):
    """Accumulate per-row sum and sum-of-squares across the lane (S) grid axis."""
    j = pl.program_id(1)

    @pl.when(j == 0)
    def _init():
        sum_ref[...] = jnp.zeros_like(sum_ref)
        sq_ref[...] = jnp.zeros_like(sq_ref)

    x = x_ref[...].astype(jnp.float32)                    # (TR, TS)
    sum_ref[...] = sum_ref[...] + jnp.sum(x, axis=1, keepdims=True)
    sq_ref[...] = sq_ref[...] + jnp.sum(x * x, axis=1, keepdims=True)


def _norm_kernel(x_ref, scale_ref, shift_ref, o_ref):
    """y = x * scale + shift with per-row (TR, 1) scale/shift."""
    x = x_ref[...].astype(jnp.float32)                    # (TR, TS)
    o_ref[...] = (x * scale_ref[...] + shift_ref[...]).astype(o_ref.dtype)


# ----------------------------- tiling ---------------------------------------


def _largest_divisor_tile(full, unit, limit):
    """Largest multiple of `unit` that divides `full` and is <= limit.
    Falls back to the full extent when `full` is not a multiple of `unit`
    (a block dim equal to the array dim is always legal)."""
    if full % unit != 0:
        return full
    best = unit
    t = unit
    cap = min(full, max(unit, limit))
    while t <= cap:
        if full % t == 0:
            best = t
        t += unit
    return best


def _pick_tiles(r, s):
    # Lane tile: 512-2048 lanes hits ~85% of HBM roofline; must be a multiple
    # of 128 (or the full extent).
    ts = _largest_divisor_tile(s, 128, 2048)
    # Sublane tile: cap the f32 x-tile at ~1 MiB so in+out double buffers stay
    # a few MiB (fits default scoped VMEM on v5e/v6e/v7x).
    row_budget = max(8, (1 << 20) // (4 * ts))
    tr = _largest_divisor_tile(r, 8, row_budget)
    return tr, ts


# ----------------------------- core -----------------------------------------


@functools.partial(jax.jit, static_argnames=("n", "c", "tr", "ts"))
def _bn3d_core(x2d, gamma, beta, *, n, c, tr, ts):
    r, s = x2d.shape
    grid_r = r // tr
    grid_s = s // ts

    # ---- pass 1: per-row sum / sum-of-squares ----
    row_sum, row_sq = pl.pallas_call(
        _stats_kernel,
        out_shape=(
            jax.ShapeDtypeStruct((r, 1), jnp.float32),
            jax.ShapeDtypeStruct((r, 1), jnp.float32),
        ),
        grid_spec=pltpu.PrefetchScalarGridSpec(
            num_scalar_prefetch=0,
            grid=(grid_r, grid_s),
            in_specs=[pl.BlockSpec((tr, ts), lambda i, j: (i, j))],
            out_specs=[
                pl.BlockSpec((tr, 1), lambda i, j: (i, 0)),
                pl.BlockSpec((tr, 1), lambda i, j: (i, 0)),
            ],
        ),
        compiler_params=pltpu.CompilerParams(
            dimension_semantics=("parallel", "arbitrary"),
            vmem_limit_bytes=_VMEM_LIMIT,
        ),
    )(x2d)

    # ---- tiny glue (XLA): rows -> channels, scale/shift vectors ----
    count = jnp.float32(n) * jnp.float32(s)
    ch_sum = row_sum.reshape(n, c).sum(axis=0)            # (C,)
    ch_sq = row_sq.reshape(n, c).sum(axis=0)              # (C,)
    mean = ch_sum / count
    var = jnp.maximum(ch_sq / count - mean * mean, 0.0)   # biased variance
    inv = jax.lax.rsqrt(var + jnp.float32(_EPS))
    scale_c = gamma.astype(jnp.float32) * inv              # (C,)
    shift_c = beta.astype(jnp.float32) - mean * scale_c    # (C,)
    scale_r = jnp.tile(scale_c, n).reshape(r, 1)            # row k = n_idx*C + c
    shift_r = jnp.tile(shift_c, n).reshape(r, 1)

    # ---- pass 2: streaming normalize ----
    y2d = pl.pallas_call(
        _norm_kernel,
        out_shape=jax.ShapeDtypeStruct((r, s), x2d.dtype),
        grid_spec=pltpu.PrefetchScalarGridSpec(
            num_scalar_prefetch=0,
            grid=(grid_r, grid_s),
            in_specs=[
                pl.BlockSpec((tr, ts), lambda i, j: (i, j)),
                pl.BlockSpec((tr, 1), lambda i, j: (i, 0)),
                pl.BlockSpec((tr, 1), lambda i, j: (i, 0)),
            ],
            out_specs=pl.BlockSpec((tr, ts), lambda i, j: (i, j)),
        ),
        compiler_params=pltpu.CompilerParams(
            dimension_semantics=("parallel", "parallel"),
            vmem_limit_bytes=_VMEM_LIMIT,
        ),
    )(x2d, scale_r, shift_r)
    return y2d


# ----------------------------- module wrapper --------------------------------


class BatchNorm3dParallelPallas:
    """JAX/Pallas equivalent of BatchNorm3dParallel (training-mode forward)."""

    def __init__(self, num_features, num_parallel):
        self.num_features = num_features
        self.num_parallel = num_parallel
        # nn.BatchNorm3d default init: weight = 1, bias = 0 (deterministic).
        self.weight = jnp.ones((num_parallel, num_features), dtype=jnp.float32)
        self.bias = jnp.zeros((num_parallel, num_features), dtype=jnp.float32)

    def __call__(self, x_parallel):
        # x_parallel: list of (N, C, D, H, W) arrays (NCDHW, like PyTorch).
        assert len(x_parallel) == self.num_parallel
        outs = []
        for i, x in enumerate(x_parallel):
            N, C, D, H, W = x.shape
            assert C == self.num_features
            R, S = N * C, D * H * W
            x2d = x.reshape(R, S)  # free reshape: NCDHW is contiguous
            tr, ts = _pick_tiles(R, S)
            y2d = _bn3d_core(
                x2d, self.weight[i], self.bias[i], n=N, c=C, tr=tr, ts=ts
            )
            outs.append(y2d.reshape(N, C, D, H, W))
        return outs


# ----------------------------- reference / test -------------------------------


def _reference_bn3d(x, gamma, beta):
    # Pure-JAX reference: training-mode BatchNorm3d over (N, D, H, W) per channel.
    mean = jnp.mean(x, axis=(0, 2, 3, 4), keepdims=True)
    var = jnp.mean((x - mean) ** 2, axis=(0, 2, 3, 4), keepdims=True)
    g = gamma.reshape(1, -1, 1, 1, 1)
    b = beta.reshape(1, -1, 1, 1, 1)
    return (x - mean) * jax.lax.rsqrt(var + _EPS) * g + b


if __name__ == "__main__":
    key = jax.random.PRNGKey(0)
    num_parallel = 2
    N, C, D, H, W = 2, 4, 4, 8, 8

    keys = jax.random.split(key, num_parallel)
    x_parallel = [
        jax.random.normal(k, (N, C, D, H, W), dtype=jnp.float32) * 2.0 + 0.5
        for k in keys
    ]

    module = BatchNorm3dParallelPallas(num_features=C, num_parallel=num_parallel)
    outs = module(x_parallel)
    outs = [jax.block_until_ready(o) for o in outs]

    # Correctness check against pure-JAX reference.
    for i, (x, y) in enumerate(zip(x_parallel, outs)):
        y_ref = _reference_bn3d(x, module.weight[i], module.bias[i])
        assert y.shape == (N, C, D, H, W)
        err = float(jnp.max(jnp.abs(y - y_ref)))
        assert err < 2e-4, f"mismatch on parallel stream {i}: {err}"

    print("KERNEL_OK")
</pallas_src>

<mosaic_0001>
module attributes {stable_mosaic.version = 11 : i64} {
  func.func @_stats_kernel(%arg0: i32, %arg1: i32, %arg2: memref<8x256xf32, #tpu.memory_space<vmem>>, %arg3: memref<8x1xf32, #tpu.memory_space<vmem>>, %arg4: memref<8x1xf32, #tpu.memory_space<vmem>>) attributes {dimension_semantics = [#tpu.dimension_semantics<parallel>, #tpu.dimension_semantics<arbitrary>], iteration_bounds = array<i64: 1, 1>, scalar_prefetch = 0 : i64, scratch_operands = 0 : i64, tpu.core_type = #tpu.core_type<tc>, window_params = [{transform_indices = @transform_0, window_bounds = array<i64: 8, 256>}, {transform_indices = @transform_1, window_bounds = array<i64: 8, 1>}, {transform_indices = @transform_2, window_bounds = array<i64: 8, 1>}]} {
    %c0_i32 = arith.constant 0 : i32
    %0 = arith.cmpi eq, %arg1, %c0_i32 : i32
    %1 = arith.extui %0 : i1 to i32
    %c0_i32_0 = arith.constant 0 : i32
    %2 = arith.cmpi ne, %1, %c0_i32_0 : i32
    scf.if %2 {
      %cst_11 = arith.constant 0.000000e+00 : f32
      %15 = vector.broadcast %cst_11 : f32 to vector<8x1xf32>
      %c0_12 = arith.constant 0 : index
      %c0_13 = arith.constant 0 : index
      %16 = vector.load %arg3[%c0_12, %c0_13] : memref<8x1xf32, #tpu.memory_space<vmem>>, vector<8x1xf32>
      tpu.vector_store %arg3[%c0_12, %c0_13], %15 {strides = array<i32>} : memref<8x1xf32, #tpu.memory_space<vmem>>, vector<8x1xf32>,
      %cst_14 = arith.constant 0.000000e+00 : f32
      %17 = vector.broadcast %cst_14 : f32 to vector<8x1xf32>
      %c0_15 = arith.constant 0 : index
      %c0_16 = arith.constant 0 : index
      %18 = vector.load %arg4[%c0_15, %c0_16] : memref<8x1xf32, #tpu.memory_space<vmem>>, vector<8x1xf32>
      tpu.vector_store %arg4[%c0_15, %c0_16], %17 {strides = array<i32>} : memref<8x1xf32, #tpu.memory_space<vmem>>, vector<8x1xf32>,
    } else {
    }
    %c0 = arith.constant 0 : index
    %c0_1 = arith.constant 0 : index
    %3 = vector.load %arg2[%c0, %c0_1] : memref<8x256xf32, #tpu.memory_space<vmem>>, vector<8x256xf32>
    %c0_2 = arith.constant 0 : index
    %c0_3 = arith.constant 0 : index
    %4 = vector.load %arg3[%c0_2, %c0_3] : memref<8x1xf32, #tpu.memory_space<vmem>>, vector<8x1xf32>
    %cst = arith.constant dense<0.000000e+00> : vector<8xf32>
    %5 = vector.multi_reduction <add>, %3, %cst [1] : vector<8x256xf32> to vector<8xf32>
    %6 = vector.shape_cast %5 : vector<8xf32> to vector<8x1xf32>
    %7 = arith.addf %4, %6 : vector<8x1xf32>
    %c0_4 = arith.constant 0 : index
    %c0_5 = arith.constant 0 : index
    %8 = vector.load %arg3[%c0_4, %c0_5] : memref<8x1xf32, #tpu.memory_space<vmem>>, vector<8x1xf32>
    tpu.vector_store %arg3[%c0_4, %c0_5], %7 {strides = array<i32>} : memref<8x1xf32, #tpu.memory_space<vmem>>, vector<8x1xf32>,
    %c0_6 = arith.constant 0 : index
    %c0_7 = arith.constant 0 : index
    %9 = vector.load %arg4[%c0_6, %c0_7] : memref<8x1xf32, #tpu.memory_space<vmem>>, vector<8x1xf32>
    %10 = arith.mulf %3, %3 : vector<8x256xf32>
    %cst_8 = arith.constant dense<0.000000e+00> : vector<8xf32>
    %11 = vector.multi_reduction <add>, %10, %cst_8 [1] : vector<8x256xf32> to vector<8xf32>
    %12 = vector.shape_cast %11 : vector<8xf32> to vector<8x1xf32>
    %13 = arith.addf %9, %12 : vector<8x1xf32>
    %c0_9 = arith.constant 0 : index
    %c0_10 = arith.constant 0 : index
    %14 = vector.load %arg4[%c0_9, %c0_10] : memref<8x1xf32, #tpu.memory_space<vmem>>, vector<8x1xf32>
    tpu.vector_store %arg4[%c0_9, %c0_10], %13 {strides = array<i32>} : memref<8x1xf32, #tpu.memory_space<vmem>>, vector<8x1xf32>,
    return
  }
  func.func @transform_0(%arg0: i32, %arg1: i32) -> (i32, i32) {
    %c0_i32 = arith.constant 0 : i32
    return %arg0, %arg1 : i32, i32
  }
  func.func @transform_1(%arg0: i32, %arg1: i32) -> (i32, i32) {
    %c0_i32 = arith.constant 0 : i32
    %c0_i32_0 = arith.constant 0 : i32
    return %arg0, %c0_i32 : i32, i32
  }
  func.func @transform_2(%arg0: i32, %arg1: i32) -> (i32, i32) {
    %c0_i32 = arith.constant 0 : i32
    %c0_i32_0 = arith.constant 0 : i32
    return %arg0, %c0_i32 : i32, i32
  }
}

module attributes {stable_mosaic.version = 11 : i64} {
  func.func @_norm_kernel(%arg0: i32, %arg1: i32, %arg2: memref<8x256xf32, #tpu.memory_space<vmem>>, %arg3: memref<8x1xf32, #tpu.memory_space<vmem>>, %arg4: memref<8x1xf32, #tpu.memory_space<vmem>>, %arg5: memref<8x256xf32, #tpu.memory_space<vmem>>) attributes {dimension_semantics = [#tpu.dimension_semantics<parallel>, #tpu.dimension_semantics<parallel>], iteration_bounds = array<i64: 1, 1>, scalar_prefetch = 0 : i64, scratch_operands = 0 : i64, tpu.core_type = #tpu.core_type<tc>, window_params = [{transform_indices = @transform_0, window_bounds = array<i64: 8, 256>}, {transform_indices = @transform_1, window_bounds = array<i64: 8, 1>}, {transform_indices = @transform_2, window_bounds = array<i64: 8, 1>}, {transform_indices = @transform_3, window_bounds = array<i64: 8, 256>}]} {
    %c0 = arith.constant 0 : index
    %c0_0 = arith.constant 0 : index
    %0 = vector.load %arg2[%c0, %c0_0] : memref<8x256xf32, #tpu.memory_space<vmem>>, vector<8x256xf32>
    %c0_1 = arith.constant 0 : index
    %c0_2 = arith.constant 0 : index
    %1 = vector.load %arg3[%c0_1, %c0_2] : memref<8x1xf32, #tpu.memory_space<vmem>>, vector<8x1xf32>
    %2 = vector.broadcast %1 : vector<8x1xf32> to vector<8x256xf32>
    %3 = arith.mulf %0, %2 : vector<8x256xf32>
    %c0_3 = arith.constant 0 : index
    %c0_4 = arith.constant 0 : index
    %4 = vector.load %arg4[%c0_3, %c0_4] : memref<8x1xf32, #tpu.memory_space<vmem>>, vector<8x1xf32>
    %5 = vector.broadcast %4 : vector<8x1xf32> to vector<8x256xf32>
    %6 = arith.addf %3, %5 : vector<8x256xf32>
    %c0_5 = arith.constant 0 : index
    %c0_6 = arith.constant 0 : index
    %7 = vector.load %arg5[%c0_5, %c0_6] : memref<8x256xf32, #tpu.memory_space<vmem>>, vector<8x256xf32>
    tpu.vector_store %arg5[%c0_5, %c0_6], %6 {strides = array<i32>} : memref<8x256xf32, #tpu.memory_space<vmem>>, vector<8x256xf32>,
    return
  }
  func.func @transform_0(%arg0: i32, %arg1: i32) -> (i32, i32) {
    %c0_i32 = arith.constant 0 : i32
    return %arg0, %arg1 : i32, i32
  }
  func.func @transform_1(%arg0: i32, %arg1: i32) -> (i32, i32) {
    %c0_i32 = arith.constant 0 : i32
    %c0_i32_0 = arith.constant 0 : i32
    return %arg0, %c0_i32 : i32, i32
  }
  func.func @transform_2(%arg0: i32, %arg1: i32) -> (i32, i32) {
    %c0_i32 = arith.constant 0 : i32
    %c0_i32_0 = arith.constant 0 : i32
    return %arg0, %c0_i32 : i32, i32
  }
  func.func @transform_3(%arg0: i32, %arg1: i32) -> (i32, i32) {
    %c0_i32 = arith.constant 0 : i32
    return %arg0, %arg1 : i32, i32
  }
}

</mosaic_0001>

<bundles_post_ra>
// kernel: tile.0
= control target key start
LH: loop header
LB: loop body
LE: loop exit
PB: predicated region body
PF: predicated region fallthrough
CT: control target
= control target key end

     0   :  { %s34_s8 = smov 125   ;;  %vm7_vm0 = vcmask 7168   ;;  %s35_s11 = smov 126   ;;  %s61_s0 = inlined_call_operand.vmem [shape: f32[2,4], index: 0, kind: input, shape index: {}]   ;;  %s62_s1 = inlined_call_operand.vmem [shape: f32[8,1], index: 1, kind: output, shape index: {}]  }
   0x1   :  { %v4_v0 = vld [vmem:[%s61_s0] sm:$0x3]  ;;  %s33_s0 = smov 127  }
   0x2   :  { %5 = vst [vmem:[#allocation0] sm:$0x3] %v4_v0 }
   0x9   :  { %v9_v1 = vld [vmem:[#allocation0] sm:$0x3]  }
   0xa   :  { %v21_v2 = vld [vmem:[#allocation0] sm:$0x3]   ;;  %10 = vrot.lane.b32.xlu0 %v9_v1, %s33_s0 }
   0xb   :  { %22 = vrot.lane.b32.xlu1 %v21_v2, %s34_s8  ;;  %v6_v3 = vld [vmem:[#allocation0] sm:$0x3]  }
   0xc   :  { %v15_v4 = vld [vmem:[#allocation0] sm:$0x3]   ;;  %8 = vst.msk [vmem:[%s62_s1] ss:$4 sm:$0x3] %vm7_vm0, %v6_v3  }
   0xe   :  { %16 = vrot.lane.b32.xlu0 %v15_v4, %s35_s11 }
  0x7c   :  { %v11_v5 = vpop.permute.xlu0 %10  }
  0x7d   :  { %v23_v6 = vpop.permute.xlu1 %22   ;;  %27 = vst.msk [vmem:[%s62_s1 + $0x1] ss:$4 sm:$0x3] %vm7_vm0, %v11_v5  }
  0x7e   :  { %29 = vst.msk [vmem:[%s62_s1 + $0x3] ss:$4 sm:$0x3] %vm7_vm0, %v23_v6  }
  0x80   :  { %v17_v7 = vpop.permute.xlu0 %16  }
  0x81   :  { %28 = vst.msk [vmem:[%s62_s1 + $0x2] ss:$4 sm:$0x3] %vm7_vm0, %v17_v7  }

// kernel: tile.18
= control target key start
LH: loop header
LB: loop body
LE: loop exit
PB: predicated region body
PF: predicated region fallthrough
CT: control target
= control target key end

     0   :  { %s22_s0 = inlined_call_operand.vmem [shape: f32[4], index: 0, kind: input, shape index: {}]   ;;  %s23_s1 = inlined_call_operand.vmem [shape: f32[2,4], index: 1, kind: output, shape index: {}]  }
   0x1   :  { %v4_v0 = vld [vmem:[%s22_s0] ss:$0 sm:$0xff] }
   0x2   :  { %5 = vst [vmem:[%s23_s1] sm:$0x3] %v4_v0 }

// kernel: _bn3d_core.2
= control target key start
LH: loop header
LB: loop body
LE: loop exit
PB: predicated region body
PF: predicated region fallthrough
CT: control target
= control target key end

     0   :  { %8 = vsyncpa [#allocation3], 0  ;;  %s81_s9 = smov [#allocation2]   ;;  %s132_s0 = inlined_call_operand.hbm [shape: f32[8,256], index: 0, kind: input, shape index: {}]   ;;  %s133_s1 = inlined_call_operand.vmem [shape: f32[8,1], index: 1, kind: output, shape index: {0}]   ;;  %s134_s2 = inlined_call_operand.vmem [shape: f32[8,1], index: 2, kind: output, shape index: {1}]  }
   0x1   :  { %s15_s10 = sshll.u32 %s81_s9, 4  ;;  %s57_s13 = scalar_lea.hbm %s132_s0, 256  ;;  %s16_s10 = int_to_ptr.vmem [resolvable:$true] %s15_s10 }
   0x2   :  { %p58_p0 = scmp.ne.s32.totalorder %s132_s0, %s57_s13  ;;  %p61_p1 = scmp.lt.u32.totalorder %s57_s13, %s132_s0 }
   0x4   :  { %p63_p2 = pnand %p61_p1, %p58_p0 }
   0x6   :  { %66 = shalt.err (!%p63_p2)
}
   0x7   :  { %s67_s18 = scalar_lea.vmem %s16_s10, 256  ;;  %p72_p4 = scmp.lt.s32.totalorder %s16_s10, %s16_s10 }
   0x8   :  { %p68_p3 = scmp.ne.s32.totalorder %s16_s10, %s67_s18  ;;  %p73_p5 = scmp.lt.s32.totalorder %s67_s18, %s67_s18 }
   0xa   :  { %p74_p6 = por %p73_p5, %p72_p4 }
   0xc   :  { %p75_p7 = pnand %p74_p6, %p68_p3 }
   0xe   :  { %78 = shalt.err (!%p75_p7)
}
   0xf   :  { %18 = dma.hbm_to_vmem [thread:$0]  %s132_s0, 256, %s16_s10, [#allocation3]  }
  0x10   :  { %79 = dma.done.wait [#allocation3], 256  }
  0x11   :  { %80 = vsyncadd [#allocation3], 4294967040  ;;  %vm26_vm0 = vcmask 7168   ;;  %v82_v0 = vmov 0.0   ;;  %v29_v1 = vld [vmem:[#allocation2] sm:$0xff]  ;;  %v30_v2 = vld [vmem:[#allocation2 + $0x8] sm:$0xff] }
  0x12   :  { %27 = vst.msk [vmem:[%s133_s1] sm:$0xff] %vm26_vm0, %v82_v0  ;;  %28 = vst.msk [vmem:[%s134_s2] sm:$0xff] %vm26_vm0, %v82_v0  ;;  %v32_v3 = vadd.f32 %v30_v2, %v29_v1  ;;  %v39_v4 = vmul.f32 %v29_v1, %v29_v1  ;;  %v40_v5 = vmul.f32 %v30_v2, %v30_v2 }
  0x14   :  { %33 = vadd.xlane.f32.xlu0 %v32_v3  ;;  %v41_v6 = vadd.f32 %v40_v5, %v39_v4 }
  0x18   :  { %42 = vadd.xlane.f32.xlu0 %v41_v6 }
  0x19   :  { %v31_v7 = vld [vmem:[%s133_s1] sm:$0xff] }
  0x1a   :  { %v38_v10 = vld [vmem:[%s134_s2] sm:$0xff] }
  0xa1   :  { %v34_v8 = vpop.xlane.xlu0 %33 }
  0xa2   :  { %v35_v9 = vadd.f32 %v34_v8, %v31_v7 }
  0xa4   :  { %37 = vst.msk [vmem:[%s133_s1] sm:$0xff] %vm26_vm0, %v35_v9 }
  0xa5   :  { %v43_v11 = vpop.xlane.xlu0 %42 }
  0xa6   :  { %v44_v12 = vadd.f32 %v43_v11, %v38_v10 }
  0xa8   :  { %45 = vst.msk [vmem:[%s134_s2] sm:$0xff] %vm26_vm0, %v44_v12 }
  0xa9   :  { %54 = vsyncpa [#allocation3], 1 }

// kernel: _bn3d_core.3
= control target key start
LH: loop header
LB: loop body
LE: loop exit
PB: predicated region body
PF: predicated region fallthrough
CT: control target
= control target key end

     0   :  { %s122_s0 = inlined_call_operand.vmem [shape: f32[8,256], index: 0, kind: input, shape index: {}]   ;;  %s123_s1 = inlined_call_operand.vmem [shape: f32[8,1], index: 1, kind: input, shape index: {}]   ;;  %s124_s2 = inlined_call_operand.vmem [shape: f32[8,1], index: 2, kind: input, shape index: {}]   ;;  %s125_s3 = inlined_call_operand.hbm [shape: f32[8,256], index: 3, kind: output, shape index: {}]  }
   0x1   :  { %v17_v0 = vld [vmem:[%s123_s1] sm:$0xff] }
   0x2   :  { %8 = vsyncpa [#allocation3], 0  ;;  %v76_v1 = vmov 0   ;;  %v25_v2 = vld [vmem:[%s124_s2] sm:$0xff]  ;;  %v16_v5 = vld [vmem:[%s122_s0 + $0x8] sm:$0xff]  ;;  %s77_s20 = smov [#allocation2]  }
   0x3   :  { %51 = vset.pattern.permute.xlu0 %v76_v1  ;;  %v15_v4 = vld [vmem:[%s122_s0] sm:$0xff]  ;;  %s41_s1 = sshll.u32 %s77_s20, 4  ;;  %s42_s1 = int_to_ptr.vmem [resolvable:$true] %s41_s1 }
   0x4   :  { %20 = vperm.xlu0 %51, %v17_v0   ;;  %s52_s2 = scalar_lea.vmem %s42_s1, 256  ;;  %p57_p1 = scmp.lt.s32.totalorder %s42_s1, %s42_s1 }
   0x5   :  { %p53_p0 = scmp.ne.s32.totalorder %s42_s1, %s52_s2  ;;  %p58_p2 = scmp.lt.s32.totalorder %s52_s2, %s52_s2 }
   0x7   :  { %p59_p3 = por %p58_p2, %p57_p1 }
   0x8   :  { %28 = vperm.xlu0 %51, %v25_v2  }
   0x9   :  { %p60_p4 = pnand %p59_p3, %p53_p0 }
  0x83   :  { %v21_v3 = vpop.permute.xlu0 %20 }
  0x84   :  { %v23_v6 = vmul.f32 %v21_v3, %v15_v4  ;;  %v24_v7 = vmul.f32 %v21_v3, %v16_v5 }
  0x87   :  { %v29_v8 = vpop.permute.xlu0 %28 }
  0x88   :  { %v31_v9 = vadd.f32 %v29_v8, %v23_v6  ;;  %v32_v10 = vadd.f32 %v29_v8, %v24_v7 }
  0x8a   :  { %33 = vst [vmem:[#allocation2] sm:$0xff] %v31_v9  ;;  %34 = vst [vmem:[#allocation2 + $0x8] sm:$0xff] %v32_v10 }
  0x8b   :  { %63 = shalt.err (!%p60_p4)
}
  0x8c   :  { %s64_s0 = scalar_lea.hbm %s125_s3, 256 }
  0x8d   :  { %p65_p5 = scmp.ne.s32.totalorder %s125_s3, %s64_s0  ;;  %p68_p6 = scmp.lt.u32.totalorder %s64_s0, %s125_s3 }
  0x8f   :  { %p70_p7 = pnand %p68_p6, %p65_p5 }
  0x91   :  { %73 = shalt.err (!%p70_p7)
}
  0x92   :  { %44 = dma.vmem_to_hbm [thread:$0]  %s42_s1, 256, %s125_s3, [#allocation3]  }
  0x93   :  { %74 = dma.done.wait [#allocation3], 256  }
  0x94   :  { %75 = vsyncadd [#allocation3], 4294967040 }
  0x95   :  { %48 = vsyncpa [#allocation3], 1 }

</bundles_post_ra>
